<compile_context>
chip_gen: v6e
topology: v6e:2x2x1
jax: 0.10.0
libtpu: 0.0.40
codegen_flags: <defaults>
</compile_context>

<pallas_src>
import functools

import jax
import jax.numpy as jnp
from jax.experimental import pallas as pl
from jax.experimental.pallas import tpu as pltpu


def _round_up(n, m):
    return ((n + m - 1) // m) * m


def _a2c_kernel(x_ref, w1a_ref, w2a_ref, out_ref, *, s_pad, h2_pad):
    x = x_ref[...]                                              # (TB, S_pad) bf16

    # Fused first layer: policy trunk + value trunk in one MXU matmul,
    # f32 accumulation.  Bias is the (sublane-aligned) last row of w1a.
    h = jnp.dot(x, w1a_ref[0:s_pad, :], preferred_element_type=jnp.float32)
    h = h + w1a_ref[s_pad:s_pad + 1, :].astype(jnp.float32)     # (TB, 2H_pad)
    h = jnp.maximum(h, 0.0)                                     # ReLU, f32 VPU

    # Fused heads: columns are [mu, sigma_pre, value]; bias folded as last row.
    z = jnp.dot(h.astype(w2a_ref.dtype), w2a_ref[0:h2_pad, :],
                preferred_element_type=jnp.float32)             # (TB, 3)
    z = z + w2a_ref[h2_pad:h2_pad + 1, :].astype(jnp.float32)

    # Lane-dense epilogue + store: transpose the tiny (TB,3) tile on the XLU
    # so the softplus/select and the output store run on dense (3, TB) vregs
    # (unmasked vst, no 128/3 lane padding in the output buffer).
    zT = jnp.transpose(z)                                       # (3, TB)

    # softplus matching torch.nn.functional.softplus (beta=1, threshold=20),
    # applied only to row 1 via a sublane-masked select (pure VPU/EUP).
    sp = jnp.where(zT > 20.0, zT, jnp.log1p(jnp.exp(jnp.minimum(zT, 20.0))))
    row = jax.lax.broadcasted_iota(jnp.int32, zT.shape, 0)
    out_ref[...] = jnp.where(row == 1, sp, zT)                  # (3, TB) f32


def fuse_a2c_params(w1, b1, w2, b2, w2_, b2_, w4v, b4v, wv5, bv5,
                    *, compute_dtype=jnp.bfloat16):
    """One-time parameter prep (not per-forward work).

    Weights come in (in_features, out_features) layout, so the kernel computes
    x @ W (== PyTorch's x @ W.T with (out, in) storage).

      W1a: (S_pad + 1, 2H_pad)   rows 0..S-1 = [w1 | w4v], row S_pad = [b1 | b4v]
      W2a: (2H_pad + 1, 3)       rows 0..H-1 = [w2, w2_, 0],
                                 rows H..2H-1 = [0, 0, wv5], row 2H_pad = biases
    Row counts are padded (zero rows) to multiples of 8 so the in-kernel
    slices [0:S_pad] / [0:2H_pad] are sublane-tile aligned.
    """
    S, H = w1.shape
    H2 = 2 * H
    s_pad = _round_up(S, 8)
    h2_pad = _round_up(H2, 8)
    f32 = jnp.float32

    w1a = jnp.zeros((s_pad + 1, h2_pad), f32)
    w1a = w1a.at[0:S, 0:H].set(w1.astype(f32))
    w1a = w1a.at[0:S, H:H2].set(w4v.astype(f32))
    w1a = w1a.at[s_pad, 0:H].set(b1.astype(f32))
    w1a = w1a.at[s_pad, H:H2].set(b4v.astype(f32))

    w2a = jnp.zeros((h2_pad + 1, 3), f32)
    w2a = w2a.at[0:H, 0].set(w2[:, 0].astype(f32))
    w2a = w2a.at[0:H, 1].set(w2_[:, 0].astype(f32))
    w2a = w2a.at[H:H2, 2].set(wv5[:, 0].astype(f32))
    w2a = w2a.at[h2_pad, 0].set(b2[0].astype(f32))
    w2a = w2a.at[h2_pad, 1].set(b2_[0].astype(f32))
    w2a = w2a.at[h2_pad, 2].set(bv5[0].astype(f32))

    return w1a.astype(compute_dtype), w2a.astype(compute_dtype)


def a2c_forward(x, w1a, w2a, *, block_b=4096):
    """x: (B, num_states) f32; w1a/w2a: pre-fused params from fuse_a2c_params.

    Returns (value, probs) with value (B, 1) and probs (B, 2, 1) in float32,
    matching the PyTorch A2C_Agent.forward output."""
    B, S = x.shape
    s_pad = w1a.shape[0] - 1
    h2_pad = w2a.shape[0] - 1
    cdt = w1a.dtype

    # Pad feature columns with zeros to match the (sublane-aligned) padded
    # weight rows, then cast to the matmul compute dtype (bf16) so the
    # dominant x HBM stream is half-width.
    if S < s_pad:
        x = jnp.pad(x, ((0, 0), (0, s_pad - S)))
    x = x.astype(cdt)

    # --- batch tile selection ------------------------------------------------
    # * TB is either == B (single tile) or a multiple of 128 so the lane-dense
    #   (3, TB) output block satisfies the (8,128) constraint.
    # * Whenever B >= 256 we force >= 2 grid steps so "parallel" actually
    #   shards across the two TensorCores on v7x.
    block_b = _round_up(block_b, 128)
    if B <= block_b:
        if B >= 256:
            TB = min(B, _round_up(pl.cdiv(B, 2), 128))
        else:
            TB = B
    else:
        TB = block_b
    grid = (pl.cdiv(B, TB),)

    cost = pl.CostEstimate(
        flops=2 * B * (s_pad * h2_pad + h2_pad * 3),
        transcendentals=2 * B * 3,
        bytes_accessed=(x.size * x.dtype.itemsize
                        + w1a.size * w1a.dtype.itemsize
                        + w2a.size * w2a.dtype.itemsize
                        + 3 * B * 4),
    )

    kernel = functools.partial(_a2c_kernel, s_pad=s_pad, h2_pad=h2_pad)
    out = pl.pallas_call(
        kernel,
        out_shape=jax.ShapeDtypeStruct((3, B), jnp.float32),
        grid_spec=pltpu.PrefetchScalarGridSpec(
            num_scalar_prefetch=0,
            grid=grid,
            in_specs=[
                pl.BlockSpec((TB, s_pad), lambda i: (i, 0)),   # x batch tile
                pl.BlockSpec(w1a.shape, lambda i: (0, 0)),     # fused layer-1
                pl.BlockSpec(w2a.shape, lambda i: (0, 0)),     # fused heads
            ],
            out_specs=pl.BlockSpec((3, TB), lambda i: (0, i)),  # lane-dense out
        ),
        compiler_params=pltpu.CompilerParams(
            dimension_semantics=("parallel",)),                 # 2 TCs on v7x
        cost_estimate=cost,
    )(x, w1a, w2a)

    value = out[2].reshape(B, 1)                      # (B, 1)
    probs = jnp.transpose(out[0:2]).reshape(B, 2, 1)  # == transpose(stack([mu, sig]), 0, 1)
    return value, probs


def init_params(key, num_states, hidden_size):
    """Deterministic init mimicking PyTorch nn.Linear defaults
    (uniform(-1/sqrt(fan_in), 1/sqrt(fan_in))). Only layers used by forward()."""
    ks = jax.random.split(key, 10)
    bs = 1.0 / jnp.sqrt(num_states)
    bh = 1.0 / jnp.sqrt(hidden_size)
    w1 = jax.random.uniform(ks[0], (num_states, hidden_size), jnp.float32, -bs, bs)
    b1 = jax.random.uniform(ks[1], (hidden_size,), jnp.float32, -bs, bs)
    w2 = jax.random.uniform(ks[2], (hidden_size, 1), jnp.float32, -bh, bh)
    b2 = jax.random.uniform(ks[3], (1,), jnp.float32, -bh, bh)
    w2_ = jax.random.uniform(ks[4], (hidden_size, 1), jnp.float32, -bh, bh)
    b2_ = jax.random.uniform(ks[5], (1,), jnp.float32, -bh, bh)
    w4v = jax.random.uniform(ks[6], (num_states, hidden_size), jnp.float32, -bs, bs)
    b4v = jax.random.uniform(ks[7], (hidden_size,), jnp.float32, -bs, bs)
    wv5 = jax.random.uniform(ks[8], (hidden_size, 1), jnp.float32, -bh, bh)
    bv5 = jax.random.uniform(ks[9], (1,), jnp.float32, -bh, bh)
    return w1, b1, w2, b2, w2_, b2_, w4v, b4v, wv5, bv5


if __name__ == "__main__":
    num_states = 16
    hidden_size = 32
    batch = 8

    key = jax.random.PRNGKey(0)
    pkey, xkey = jax.random.split(key)
    params = init_params(pkey, num_states, hidden_size)
    w1, b1, w2, b2, w2_, b2_, w4v, b4v, wv5, bv5 = params

    # One-time parameter fusion (done once, outside the forward path).
    w1a, w2a = fuse_a2c_params(*params)
    w1a, w2a = jax.block_until_ready((w1a, w2a))

    fwd = jax.jit(a2c_forward)

    def ref_forward(x):
        # Pure-JAX reference mirroring the kernel's mixed precision:
        # bf16 matmul operands, f32 accumulation, f32 epilogue (matches the
        # PyTorch A2C_Agent.forward math up to bf16 operand rounding).
        bf = lambda a: a.astype(jnp.bfloat16).astype(jnp.float32)
        xc = bf(x)
        hx = jnp.maximum(xc @ bf(w1) + bf(b1), 0.0)
        hy = jnp.maximum(xc @ bf(w4v) + bf(b4v), 0.0)
        mu = bf(hx) @ bf(w2) + bf(b2)
        s = bf(hx) @ bf(w2_) + bf(b2_)
        sig = jnp.where(s > 20.0, s, jnp.log1p(jnp.exp(jnp.minimum(s, 20.0))))
        val = bf(hy) @ bf(wv5) + bf(bv5)
        probs = jnp.stack([mu, sig], axis=0).transpose(1, 0, 2)   # (B, 2, 1)
        return val, probs

    # Check the single-tile path (B=8) and the multi-tile / lane-dense path
    # (B=384 -> TB=256, grid=2, partial last tile).
    for B in (batch, 384):
        x = jax.random.normal(jax.random.fold_in(xkey, B), (B, num_states),
                              jnp.float32)
        value, probs = jax.block_until_ready(fwd(x, w1a, w2a))
        val_ref, probs_ref = ref_forward(x)

        assert value.shape == (B, 1), value.shape
        assert probs.shape == (B, 2, 1), probs.shape
        assert jnp.allclose(value, val_ref, atol=2e-3, rtol=2e-3), (
            "value mismatch", B, float(jnp.max(jnp.abs(value - val_ref))))
        assert jnp.allclose(probs, probs_ref, atol=2e-3, rtol=2e-3), (
            "probs mismatch", B, float(jnp.max(jnp.abs(probs - probs_ref))))

    print("KERNEL_OK")
</pallas_src>

<mosaic_0001>
module attributes {stable_mosaic.version = 11 : i64} {
  func.func @_a2c_kernel(%arg0: i32, %arg1: memref<8x16xbf16, #tpu.memory_space<vmem>>, %arg2: memref<17x64xbf16, #tpu.memory_space<vmem>>, %arg3: memref<65x3xbf16, #tpu.memory_space<vmem>>, %arg4: memref<3x8xf32, #tpu.memory_space<vmem>>) attributes {dimension_semantics = [#tpu.dimension_semantics<parallel>], iteration_bounds = array<i64: 1>, scalar_prefetch = 0 : i64, scratch_operands = 0 : i64, tpu.core_type = #tpu.core_type<tc>, window_params = [{transform_indices = @transform_0, window_bounds = array<i64: 8, 16>}, {pipeline_mode = #tpu.pipeline_mode<synchronous>, transform_indices = @transform_1, window_bounds = array<i64: 17, 64>}, {pipeline_mode = #tpu.pipeline_mode<synchronous>, transform_indices = @transform_2, window_bounds = array<i64: 65, 3>}, {transform_indices = @transform_3, window_bounds = array<i64: 3, 8>}]} {
    %c0 = arith.constant 0 : index
    %c0_0 = arith.constant 0 : index
    %0 = vector.load %arg1[%c0, %c0_0] : memref<8x16xbf16, #tpu.memory_space<vmem>>, vector<8x16xbf16>
    %c0_1 = arith.constant 0 : index
    %c0_2 = arith.constant 0 : index
    %1 = vector.load %arg2[%c0_1, %c0_2] : memref<17x64xbf16, #tpu.memory_space<vmem>>, vector<16x64xbf16>
    %cst = arith.constant dense<0.000000e+00> : vector<8x64xf32>
    %2 = tpu.matmul %0, %1, %cst {dimension_numbers = #tpu.dot_dimension_numbers<[1], [0], [0], [1], [0, 0, 1, 1], [], []>} : vector<8x16xbf16>, vector<16x64xbf16>, vector<8x64xf32> -> vector<8x64xf32>
    %c16 = arith.constant 16 : index
    %c0_3 = arith.constant 0 : index
    %3 = vector.load %arg2[%c16, %c0_3] : memref<17x64xbf16, #tpu.memory_space<vmem>>, vector<1x64xbf16>
    %4 = arith.extf %3 : vector<1x64xbf16> to vector<1x64xf32>
    %5 = vector.broadcast %4 : vector<1x64xf32> to vector<8x64xf32>
    %6 = arith.addf %2, %5 : vector<8x64xf32>
    %cst_4 = arith.constant 0.000000e+00 : f32
    %7 = vector.broadcast %cst_4 : f32 to vector<8x64xf32>
    %8 = arith.maximumf %6, %7 : vector<8x64xf32>
    %9 = arith.truncf %8 : vector<8x64xf32> to vector<8x64xbf16>
    %c0_5 = arith.constant 0 : index
    %c0_6 = arith.constant 0 : index
    %10 = vector.load %arg3[%c0_5, %c0_6] : memref<65x3xbf16, #tpu.memory_space<vmem>>, vector<64x3xbf16>
    %cst_7 = arith.constant dense<0.000000e+00> : vector<8x3xf32>
    %11 = tpu.matmul %9, %10, %cst_7 {dimension_numbers = #tpu.dot_dimension_numbers<[1], [0], [0], [1], [0, 0, 1, 1], [], []>} : vector<8x64xbf16>, vector<64x3xbf16>, vector<8x3xf32> -> vector<8x3xf32>
    %c64 = arith.constant 64 : index
    %c0_8 = arith.constant 0 : index
    %12 = vector.load %arg3[%c64, %c0_8] : memref<65x3xbf16, #tpu.memory_space<vmem>>, vector<1x3xbf16>
    %13 = arith.extf %12 : vector<1x3xbf16> to vector<1x3xf32>
    %14 = vector.broadcast %13 : vector<1x3xf32> to vector<8x3xf32>
    %15 = arith.addf %11, %14 : vector<8x3xf32>
    %16 = tpu.transpose %15, [1, 0] : vector<8x3xf32> -> vector<3x8xf32>
    %cst_9 = arith.constant 2.000000e+01 : f32
    %17 = vector.broadcast %cst_9 : f32 to vector<3x8xf32>
    %18 = arith.cmpf ogt, %16, %17 : vector<3x8xf32>
    %cst_10 = arith.constant 2.000000e+01 : f32
    %19 = vector.broadcast %cst_10 : f32 to vector<3x8xf32>
    %20 = arith.minimumf %16, %19 : vector<3x8xf32>
    %21 = math.exp %20 : vector<3x8xf32>
    %22 = math.log1p %21 : vector<3x8xf32>
    %23 = arith.select %18, %16, %22 : vector<3x8xi1>, vector<3x8xf32>
    %24 = tpu.iota {dimensions = array<i32: 0>} : vector<3x8xi32>
    %c1_i32 = arith.constant 1 : i32
    %25 = vector.broadcast %c1_i32 : i32 to vector<3x8xi32>
    %26 = arith.cmpi eq, %24, %25 : vector<3x8xi32>
    %27 = arith.select %26, %23, %16 : vector<3x8xi1>, vector<3x8xf32>
    %c0_11 = arith.constant 0 : index
    %c0_12 = arith.constant 0 : index
    %28 = vector.load %arg4[%c0_11, %c0_12] : memref<3x8xf32, #tpu.memory_space<vmem>>, vector<3x8xf32>
    tpu.vector_store %arg4[%c0_11, %c0_12], %27 {strides = array<i32>} : memref<3x8xf32, #tpu.memory_space<vmem>>, vector<3x8xf32>,
    return
  }
  func.func @transform_0(%arg0: i32) -> (i32, i32) {
    %c0_i32 = arith.constant 0 : i32
    %c0_i32_0 = arith.constant 0 : i32
    return %arg0, %c0_i32 : i32, i32
  }
  func.func @transform_1(%arg0: i32) -> (i32, i32) {
    %c0_i32 = arith.constant 0 : i32
    %c0_i32_0 = arith.constant 0 : i32
    %c0_i32_1 = arith.constant 0 : i32
    return %c0_i32, %c0_i32_0 : i32, i32
  }
  func.func @transform_2(%arg0: i32) -> (i32, i32) {
    %c0_i32 = arith.constant 0 : i32
    %c0_i32_0 = arith.constant 0 : i32
    %c0_i32_1 = arith.constant 0 : i32
    return %c0_i32, %c0_i32_0 : i32, i32
  }
  func.func @transform_3(%arg0: i32) -> (i32, i32) {
    %c0_i32 = arith.constant 0 : i32
    %c0_i32_0 = arith.constant 0 : i32
    return %c0_i32, %arg0 : i32, i32
  }
}

</mosaic_0001>

<bundles_post_ra>
// kernel: a2c_forward.1
= control target key start
LH: loop header
LB: loop body
LE: loop exit
PB: predicated region body
PF: predicated region fallthrough
CT: control target
= control target key end

     0   :  { %v257_v0 = vmov 0.0   ;;  %vm258_vm0 = vmmov 0   ;;  %vm30_vm1 = vcmask 130048   ;;  %v20_v7 = vlaneseq  ;;  %s306_s1 = inlined_call_operand.vmem [shape: bf16[17,64], index: 1, kind: input, shape index: {}]   ;;  %s307_s0 = inlined_call_operand.vmem [shape: bf16[8,16], index: 0, kind: input, shape index: {}]   ;;  %s308_s2 = inlined_call_operand.vmem [shape: bf16[65,3], index: 2, kind: input, shape index: {}]   ;;  %s309_s3 = inlined_call_operand.vmem [shape: f32[3,8], index: 3, kind: output, shape index: {}]  }
   0x1   :  { %228 = vmatprep.subr.bf16.mxu0 %v257_v0  ;;  %v248_v1 = vld [vmem:[%s306_s1] sm:$0xff]   ;;  %230 = vmatprep.mubr.msk.bf16.mxu0 %vm258_vm0, %v257_v0  ;;  %v249_v3 = vld [vmem:[%s308_s2 + $0x18] sm:$0xff]   ;;  %v250_v4 = vld [vmem:[%s308_s2 + $0x10] sm:$0xff]   ;;  %vm114_vm2 = vcmask 523264   ;;  %vm208_vm5 = vcmask 59392  }
   0x2   :  { %v15_v2 = vld [vmem:[%s307_s0] sm:$0xf]  ;;  %234 = vmatprep.subr.bf16.mxu1 %v257_v0  ;;  %242 = vmatprep.mubr.msk.bf16.mxu1 %vm258_vm0, %v257_v0  ;;  %v251_v5 = vld [vmem:[%s308_s2 + $0x8] sm:$0xff]   ;;  %v21_v8 = vshrl.u32 %v20_v7, 7 }
   0x3   :  { %229 = vmatpush3.bf16.msra.mxu0 %v248_v1  ;;  %235 = vmatpush3.bf16.msra.mxu1 %v249_v3  ;;  %v252_v6 = vld [vmem:[%s308_s2] sm:$0xff]   ;;  %v18_v9 = vld [vmem:[%s306_s1 + $0x8] sm:$0x1] }
   0x4   :  { %236 = vmatprep.subr.bf16.mxu1 %v257_v0  ;;  %v19_v10 = vunpack.c.l.bf16 %v18_v9  ;;  %v22_v11 = vsub.s32 0, %v21_v8  ;;  %v84_v20 = vld [vmem:[%s308_s2 + $0x20] sm:$0x1]  ;;  %vm206_vm3 = vcmp.eq.s32.totalorder %v21_v8, 1 }
   0x5   :  { %v85_v21 = vunpack.c.l.bf16 %v84_v20 }
   0x6   :  { %231 = vmatmul.mubr.msk.bf16.vlgmr.msra.gmra.mxu0 %vm30_vm1, %v15_v2  ;;  %v23_v12 = vrot.slane %v19_v10, %v22_v11 }
   0x7   :  { %237 = vmatpush3.bf16.msra.mxu1 %v250_v4  ;;  %v89_v22 = vrot.slane %v85_v21, %v22_v11 }
   0x8   :  { %238 = vmatprep.subr.bf16.mxu1 %v257_v0 }
   0xb   :  { %239 = vmatpush3.bf16.msra.mxu1 %v251_v5 }
   0xc   :  { %240 = vmatprep.subr.bf16.mxu1 %v257_v0 }
   0xf   :  { %241 = vmatpush3.bf16.msra.mxu1 %v252_v6 }
  0xc6   :  { %v68_v13 = vpop.f32.mrf.mxu0 }
  0xc7   :  { %v69_v14 = vadd.f32 %v68_v13, %v23_v12 }
  0xc8   :  { %v232_v15 = vpop.f32.mrf.mxu0 }
  0xc9   :  { %v74_v16 = vmax.f32 %v69_v14, 0.0 }
  0xca   :  { %v71_v17 = vpop.f32.mrf.mxu0 }
  0xcb   :  { %v75_v18 = vpack.c.bf16 %v74_v16, %v74_v16 }
  0xcc   :  { %v233_v19 = vpop.f32.mrf.mxu0 }
  0xcd   :  { %243 = vmatmul.mubr.msk.bf16.vlgmr.msra.gmra.mxu1 %vm114_vm2, %v75_v18 }
 0x18d   :  { %v152_v23 = vpop.f32.mrf.mxu1 }
 0x18e   :  { %v153_v24 = vadd.f32 %v152_v23, %v89_v22 }
 0x18f   :  { %v244_v25 = vpop.f32.mrf.mxu1 }
 0x190   :  { %158 = vxpose.xlu0.b32.start.end [1/1] (short) (narrow) %v153_v24, 8 }
 0x191   :  { %v155_v26 = vpop.f32.mrf.mxu1 }
 0x193   :  { %v245_v27 = vpop.f32.mrf.mxu1 }
 0x20c   :  { %v174_v28 = vpop.trf.xlu0 }
 0x20d   :  { %v191_v29 = vmin.f32 %v174_v28, 20.0  ;;  %vm190_vm6 = vcmp.gt.f32.partialorder %v174_v28, 20.0 }
 0x20f   :  { %v192_v30 = vmul.f32 1.442695, %v191_v29 }
 0x211   :  { %253 = vpow2.f32 %v192_v30 }
 0x21e   :  { %v254_v31 = vpop.eup %253 }
 0x21f   :  { %v194_v32 = vadd.f32 1.0, %v254_v31  ;;  %v197_v33 = vmul.f32 -0.5, %v254_v31  ;;  %v200_v35 = vand.u32 2147483647, %v254_v31 }
 0x221   :  { %255 = vlog2.f32 %v194_v32  ;;  %v198_v34 = vadd.f32 1.0, %v197_v33  ;;  %vm201_vm4 = vcmp.lt.f32.partialorder %v200_v35, 0.0004427343 }
 0x223   :  { %v199_v38 = vmul.f32 %v254_v31, %v198_v34 }
 0x22e   :  { %v256_v36 = vpop.eup %255 }
 0x22f   :  { %v196_v37 = vmul.f32 0.6931472, %v256_v36 }
 0x231   :  { %v202_v39 = vsel %vm201_vm4, %v199_v38, %v196_v37 }
 0x232   :  { %v203_v40 = vsel %vm190_vm6, %v174_v28, %v202_v39 }
 0x233   :  { %v207_v41 = vsel %vm206_vm3, %v203_v40, %v174_v28 }
 0x234   :  { %209 = vst.msk [vmem:[%s309_s3] sm:$0x7] %vm208_vm5, %v207_v41 }

</bundles_post_ra>
